<compile_context>
chip_gen: v5e
topology: v5e:2x2
jax: 0.10.0
libtpu: 0.0.40
codegen_flags: <defaults>
</compile_context>

<pallas_src>
import jax
import jax.numpy as jnp
from jax.experimental import pallas as pl
from jax.experimental.pallas import tpu as pltpu


def context_gating_kernel(xm_ref, w_ref, xg_ref, gamma_ref, beta_ref, o_ref,
                          *scratch):
    """One (n, k) grid step: partial matmul into the accumulator; on the last
    K step fuse BatchNorm (batch stats) + GLU gate into the output block."""
    # f32 output: accumulate straight into the VMEM-resident output block (its
    # block index is constant across k).  Non-f32 output: f32 scratch.
    acc_ref = scratch[0] if scratch else o_ref

    k = pl.program_id(1)

    @pl.when(k == 0)
    def _init():
        acc_ref[...] = jnp.zeros_like(acc_ref)

    # (B, tk) @ (tk, tn) on the MXU; operands may be bf16, accumulation is f32.
    acc_ref[...] += jnp.dot(xm_ref[...], w_ref[...],
                            preferred_element_type=jnp.float32)

    @pl.when(k == pl.num_programs(1) - 1)
    def _finalize():
        eps = 1e-5
        x1 = acc_ref[...]                                   # (B, tn) f32
        # The full batch lives in every block -> exact per-feature batch stats.
        mean = jnp.mean(x1, axis=0, keepdims=True)          # (1, tn)
        diff = x1 - mean
        var = jnp.mean(diff * diff, axis=0, keepdims=True)  # biased variance
        inv_std = jax.lax.rsqrt(var + eps)                  # EUP
        # Fused BN epilogue: two FMAs over (B, tn).
        scale = gamma_ref[...] * inv_std                    # (1, tn)
        shift = beta_ref[...] - mean * scale                # (1, tn)
        x1n = x1 * scale + shift
        # GLU(cat((x, x1), 1), dim=1) == x * sigmoid(x1n)
        gate = jax.nn.sigmoid(x1n)                          # EUP
        o_ref[...] = (xg_ref[...].astype(jnp.float32) * gate).astype(o_ref.dtype)


def _vmem_limit_bytes():
    """Scoped-VMEM limit with headroom, derived from the actual chip.
    ~48 MiB on v7x (64 MiB physical), ~112 MiB on v5e/v6e (128 MiB)."""
    phys = 64 * 1024 * 1024  # conservative default = smallest (v7x) VMEM
    try:
        got = int(getattr(pltpu.get_tpu_info(), "vmem_capacity_bytes", phys))
        if got >= 32 * 1024 * 1024:
            phys = got
    except Exception:
        pass
    return max(phys - 16 * 1024 * 1024, (phys * 3) // 4)


def _tile_candidates(d):
    cands = [t for t in range(128, d + 1, 128) if d % t == 0]
    return sorted(cands, reverse=True) if cands else [d]


def _select_tiles(B, D, xm_bytes, w_bytes, xg_bytes, out_bytes, need_scratch,
                  budget):
    """Largest (tn, tk) whose double-buffered footprint fits the VMEM budget."""
    cands = _tile_candidates(D)
    # Prefer >= 2 feature blocks so both v7x TensorCores get work on the
    # "parallel" axis (costs only a couple of extra grid steps elsewhere).
    tn_cands = [t for t in cands if D // t >= 2] or cands

    def footprint(tn, tk):
        fp = 2 * B * tk * xm_bytes          # matmul x tiles (double-buffered)
        fp += 2 * tk * tn * w_bytes         # weight tiles
        fp += 2 * B * tn * xg_bytes         # gate x tiles
        fp += 2 * B * tn * out_bytes        # output tiles
        fp += 2 * 2 * tn * 4                # gamma / beta tiles
        if need_scratch:
            fp += B * tn * 4                # f32 accumulator scratch
        return fp

    for tn in tn_cands:                     # largest tiles first
        for tk in cands:
            if footprint(tn, tk) <= budget:
                return tn, tk
    # Nothing fits (very large B): fall back to the smallest tiles and let the
    # compiler report the overflow loudly.  TODO(synk): tile B with a two-pass
    # / Welford cross-block BN-stat accumulation for huge batches.
    return tn_cands[-1], cands[-1]


def context_gating(x, w, b, gamma, beta, *, use_bf16_matmul=False):
    """Context_Gating forward.  x: (B, D); w: (D, D) in nn.Linear
    (out_features, in_features) layout; b / gamma / beta: (D,).

    `b` is accepted for API parity with nn.Linear but is NOT used: the
    training-mode BatchNorm1d subtracts the per-feature batch mean right after
    the Linear, so a constant per-feature bias cancels exactly.
    """
    del b
    B, D = x.shape
    assert w.shape == (D, D) and gamma.shape == (D,) and beta.shape == (D,)

    out_dtype = x.dtype
    mm_dtype = jnp.bfloat16 if use_bf16_matmul else jnp.float32

    # One-time transpose (+ optional bf16 cast) of W to (in, out): the
    # in-kernel dot is then a pure (B,K)x(K,N) vmatmul with no per-tile
    # relayout.  Under jit this fuses into a single pass over W and is
    # amortized across calls for a fixed nn.Linear weight.
    w_t = jnp.transpose(w).astype(mm_dtype)
    xm = x.astype(mm_dtype)                       # matmul operand only
    g2 = gamma.reshape(1, D).astype(jnp.float32)
    b2 = beta.reshape(1, D).astype(jnp.float32)

    need_scratch = out_dtype != jnp.float32
    vmem_limit = int(_vmem_limit_bytes())
    tn, tk = _select_tiles(
        B, D,
        xm_bytes=xm.dtype.itemsize, w_bytes=w_t.dtype.itemsize,
        xg_bytes=x.dtype.itemsize, out_bytes=jnp.dtype(out_dtype).itemsize,
        need_scratch=need_scratch,
        budget=int(vmem_limit * 0.9))

    grid = (D // tn, D // tk)  # (feature blocks "parallel", K blocks "arbitrary")
    scratch_shapes = [pltpu.VMEM((B, tn), jnp.float32)] if need_scratch else []

    # TODO(synk): sweep pipeline_mode=pl.Buffered(3) on the W BlockSpec if the
    # weight DMA shows up exposed at small B in the bundle/xprof trace.
    # TODO(synk): when B*D*4 fits comfortably in VMEM, a resident full-x block
    # (constant index_map + in-kernel pl.ds slicing) would avoid re-streaming
    # x once per feature block.
    return pl.pallas_call(
        context_gating_kernel,
        out_shape=jax.ShapeDtypeStruct((B, D), out_dtype),
        grid_spec=pltpu.PrefetchScalarGridSpec(
            num_scalar_prefetch=0,
            grid=grid,
            in_specs=[
                pl.BlockSpec((B, tk), lambda n, k: (0, k)),   # x (matmul, K-sliced)
                pl.BlockSpec((tk, tn), lambda n, k: (k, n)),  # W^T tile
                pl.BlockSpec((B, tn), lambda n, k: (0, n)),   # x (gate, const over k)
                pl.BlockSpec((1, tn), lambda n, k: (0, n)),   # gamma
                pl.BlockSpec((1, tn), lambda n, k: (0, n)),   # beta
            ],
            out_specs=pl.BlockSpec((B, tn), lambda n, k: (0, n)),
            scratch_shapes=scratch_shapes,
        ),
        compiler_params=pltpu.CompilerParams(
            dimension_semantics=("parallel", "arbitrary"),
            vmem_limit_bytes=vmem_limit,
        ),
    )(xm, w_t, x, g2, b2)


if __name__ == "__main__":
    B, D = 8, 128   # small, (8,128)-tile aligned

    key = jax.random.PRNGKey(0)
    kx, kw, kb = jax.random.split(key, 3)

    x = jax.random.normal(kx, (B, D), dtype=jnp.float32)

    # Deterministic parameter init (PyTorch-Linear-style uniform +-1/sqrt(D))
    bound = 1.0 / (D ** 0.5)
    w = jax.random.uniform(kw, (D, D), minval=-bound, maxval=bound,
                           dtype=jnp.float32)        # (out_features, in_features)
    b = jax.random.uniform(kb, (D,), minval=-bound, maxval=bound,
                           dtype=jnp.float32)
    gamma = jnp.ones((D,), dtype=jnp.float32)         # BatchNorm1d weight init
    beta = jnp.zeros((D,), dtype=jnp.float32)         # BatchNorm1d bias init

    # Reference (training-mode BN, biased variance), including the Linear bias
    # — it cancels through the BN batch-mean subtraction.
    x1 = x @ w.T + b
    mean = jnp.mean(x1, axis=0, keepdims=True)
    var = jnp.mean((x1 - mean) ** 2, axis=0, keepdims=True)
    x1n = (x1 - mean) / jnp.sqrt(var + 1e-5) * gamma + beta
    ref = x * jax.nn.sigmoid(x1n)

    # Default f32 MXU path — tight tolerance vs. the f32 reference.
    out = jax.block_until_ready(context_gating(x, w, b, gamma, beta))
    assert jnp.allclose(out, ref, atol=1e-5, rtol=1e-5), "f32 path mismatch"

    # bf16-operand path (halves HBM traffic on the W stream) — looser tolerance.
    out_bf16 = jax.block_until_ready(
        context_gating(x, w, b, gamma, beta, use_bf16_matmul=True))
    assert jnp.allclose(out_bf16, ref, atol=5e-2, rtol=0.0), "bf16 path mismatch"

    print("KERNEL_OK")
</pallas_src>

<mosaic_0001>
module attributes {stable_mosaic.version = 11 : i64} {
  func.func @context_gating_kernel(%arg0: i32, %arg1: i32, %arg2: memref<8x128xf32, #tpu.memory_space<vmem>>, %arg3: memref<128x128xf32, #tpu.memory_space<vmem>>, %arg4: memref<8x128xf32, #tpu.memory_space<vmem>>, %arg5: memref<1x128xf32, #tpu.memory_space<vmem>>, %arg6: memref<1x128xf32, #tpu.memory_space<vmem>>, %arg7: memref<8x128xf32, #tpu.memory_space<vmem>>) attributes {dimension_semantics = [#tpu.dimension_semantics<parallel>, #tpu.dimension_semantics<arbitrary>], iteration_bounds = array<i64: 1, 1>, scalar_prefetch = 0 : i64, scratch_operands = 0 : i64, tpu.core_type = #tpu.core_type<tc>, window_params = [{transform_indices = @transform_0, window_bounds = array<i64: 8, 128>}, {transform_indices = @transform_1, window_bounds = array<i64: 128, 128>}, {transform_indices = @transform_2, window_bounds = array<i64: 8, 128>}, {transform_indices = @transform_3, window_bounds = array<i64: 1, 128>}, {transform_indices = @transform_4, window_bounds = array<i64: 1, 128>}, {transform_indices = @transform_5, window_bounds = array<i64: 8, 128>}]} {
    %c0_i32 = arith.constant 0 : i32
    %0 = arith.cmpi eq, %arg1, %c0_i32 : i32
    %1 = arith.extui %0 : i1 to i32
    %c0_i32_0 = arith.constant 0 : i32
    %2 = arith.cmpi ne, %1, %c0_i32_0 : i32
    scf.if %2 {
      %cst_10 = arith.constant 0.000000e+00 : f32
      %12 = vector.broadcast %cst_10 : f32 to vector<8x128xf32>
      %c0_11 = arith.constant 0 : index
      %c0_12 = arith.constant 0 : index
      %13 = vector.load %arg7[%c0_11, %c0_12] : memref<8x128xf32, #tpu.memory_space<vmem>>, vector<8x128xf32>
      tpu.vector_store %arg7[%c0_11, %c0_12], %12 {strides = array<i32>} : memref<8x128xf32, #tpu.memory_space<vmem>>, vector<8x128xf32>,
    } else {
    }
    %c0 = arith.constant 0 : index
    %c0_1 = arith.constant 0 : index
    %3 = vector.load %arg7[%c0, %c0_1] : memref<8x128xf32, #tpu.memory_space<vmem>>, vector<8x128xf32>
    %c0_2 = arith.constant 0 : index
    %c0_3 = arith.constant 0 : index
    %4 = vector.load %arg2[%c0_2, %c0_3] : memref<8x128xf32, #tpu.memory_space<vmem>>, vector<8x128xf32>
    %c0_4 = arith.constant 0 : index
    %c0_5 = arith.constant 0 : index
    %5 = vector.load %arg3[%c0_4, %c0_5] : memref<128x128xf32, #tpu.memory_space<vmem>>, vector<128x128xf32>
    %cst = arith.constant dense<0.000000e+00> : vector<8x128xf32>
    %6 = tpu.matmul %4, %5, %cst {dimension_numbers = #tpu.dot_dimension_numbers<[1], [0], [0], [1], [0, 0, 1, 1], [], []>} : vector<8x128xf32>, vector<128x128xf32>, vector<8x128xf32> -> vector<8x128xf32>
    %7 = arith.addf %3, %6 : vector<8x128xf32>
    %c0_6 = arith.constant 0 : index
    %c0_7 = arith.constant 0 : index
    %8 = vector.load %arg7[%c0_6, %c0_7] : memref<8x128xf32, #tpu.memory_space<vmem>>, vector<8x128xf32>
    tpu.vector_store %arg7[%c0_6, %c0_7], %7 {strides = array<i32>} : memref<8x128xf32, #tpu.memory_space<vmem>>, vector<8x128xf32>,
    %c0_i32_8 = arith.constant 0 : i32
    %9 = arith.cmpi eq, %arg1, %c0_i32_8 : i32
    %10 = arith.extui %9 : i1 to i32
    %c0_i32_9 = arith.constant 0 : i32
    %11 = arith.cmpi ne, %10, %c0_i32_9 : i32
    scf.if %11 {
      %c0_10 = arith.constant 0 : index
      %c0_11 = arith.constant 0 : index
      %12 = vector.load %arg7[%c0_10, %c0_11] : memref<8x128xf32, #tpu.memory_space<vmem>>, vector<8x128xf32>
      %cst_12 = arith.constant dense<0.000000e+00> : vector<128xf32>
      %13 = vector.multi_reduction <add>, %12, %cst_12 [0] : vector<8x128xf32> to vector<128xf32>
      %14 = vector.shape_cast %13 : vector<128xf32> to vector<1x128xf32>
      %cst_13 = arith.constant 8.000000e+00 : f32
      %15 = vector.broadcast %cst_13 : f32 to vector<1x128xf32>
      %16 = arith.divf %14, %15 : vector<1x128xf32>
      %17 = vector.broadcast %16 : vector<1x128xf32> to vector<8x128xf32>
      %18 = arith.subf %12, %17 : vector<8x128xf32>
      %19 = arith.mulf %18, %18 : vector<8x128xf32>
      %cst_14 = arith.constant dense<0.000000e+00> : vector<128xf32>
      %20 = vector.multi_reduction <add>, %19, %cst_14 [0] : vector<8x128xf32> to vector<128xf32>
      %21 = vector.shape_cast %20 : vector<128xf32> to vector<1x128xf32>
      %cst_15 = arith.constant 8.000000e+00 : f32
      %22 = vector.broadcast %cst_15 : f32 to vector<1x128xf32>
      %23 = arith.divf %21, %22 : vector<1x128xf32>
      %cst_16 = arith.constant 9.99999974E-6 : f32
      %24 = vector.broadcast %cst_16 : f32 to vector<1x128xf32>
      %25 = arith.addf %23, %24 : vector<1x128xf32>
      %26 = math.rsqrt %25 : vector<1x128xf32>
      %c0_17 = arith.constant 0 : index
      %c0_18 = arith.constant 0 : index
      %27 = vector.load %arg5[%c0_17, %c0_18] : memref<1x128xf32, #tpu.memory_space<vmem>>, vector<1x128xf32>
      %28 = arith.mulf %27, %26 : vector<1x128xf32>
      %c0_19 = arith.constant 0 : index
      %c0_20 = arith.constant 0 : index
      %29 = vector.load %arg6[%c0_19, %c0_20] : memref<1x128xf32, #tpu.memory_space<vmem>>, vector<1x128xf32>
      %30 = arith.mulf %16, %28 : vector<1x128xf32>
      %31 = arith.subf %29, %30 : vector<1x128xf32>
      %32 = vector.broadcast %28 : vector<1x128xf32> to vector<8x128xf32>
      %33 = arith.mulf %12, %32 : vector<8x128xf32>
      %34 = vector.broadcast %31 : vector<1x128xf32> to vector<8x128xf32>
      %35 = arith.addf %33, %34 : vector<8x128xf32>
      %36 = arith.negf %35 : vector<8x128xf32>
      %37 = math.exp %36 : vector<8x128xf32>
      %cst_21 = arith.constant 1.000000e+00 : f32
      %38 = vector.broadcast %cst_21 : f32 to vector<8x128xf32>
      %39 = arith.addf %38, %37 : vector<8x128xf32>
      %40 = arith.divf %38, %39 : vector<8x128xf32>
      %c0_22 = arith.constant 0 : index
      %c0_23 = arith.constant 0 : index
      %41 = vector.load %arg4[%c0_22, %c0_23] : memref<8x128xf32, #tpu.memory_space<vmem>>, vector<8x128xf32>
      %42 = arith.mulf %41, %40 : vector<8x128xf32>
      %c0_24 = arith.constant 0 : index
      %c0_25 = arith.constant 0 : index
      %43 = vector.load %arg7[%c0_24, %c0_25] : memref<8x128xf32, #tpu.memory_space<vmem>>, vector<8x128xf32>
      tpu.vector_store %arg7[%c0_24, %c0_25], %42 {strides = array<i32>} : memref<8x128xf32, #tpu.memory_space<vmem>>, vector<8x128xf32>,
    } else {
    }
    return
  }
  func.func @transform_0(%arg0: i32, %arg1: i32) -> (i32, i32) {
    %c0_i32 = arith.constant 0 : i32
    %c0_i32_0 = arith.constant 0 : i32
    return %c0_i32, %arg1 : i32, i32
  }
  func.func @transform_1(%arg0: i32, %arg1: i32) -> (i32, i32) {
    %c0_i32 = arith.constant 0 : i32
    return %arg1, %arg0 : i32, i32
  }
  func.func @transform_2(%arg0: i32, %arg1: i32) -> (i32, i32) {
    %c0_i32 = arith.constant 0 : i32
    %c0_i32_0 = arith.constant 0 : i32
    return %c0_i32, %arg0 : i32, i32
  }
  func.func @transform_3(%arg0: i32, %arg1: i32) -> (i32, i32) {
    %c0_i32 = arith.constant 0 : i32
    %c0_i32_0 = arith.constant 0 : i32
    return %c0_i32, %arg0 : i32, i32
  }
  func.func @transform_4(%arg0: i32, %arg1: i32) -> (i32, i32) {
    %c0_i32 = arith.constant 0 : i32
    %c0_i32_0 = arith.constant 0 : i32
    return %c0_i32, %arg0 : i32, i32
  }
  func.func @transform_5(%arg0: i32, %arg1: i32) -> (i32, i32) {
    %c0_i32 = arith.constant 0 : i32
    %c0_i32_0 = arith.constant 0 : i32
    return %c0_i32, %arg0 : i32, i32
  }
}

</mosaic_0001>

<bundles_post_ra>
// kernel: tpu_custom_call.1
= control target key start
LH: loop header
LB: loop body
LE: loop exit
PB: predicated region body
PF: predicated region fallthrough
CT: control target
= control target key end

     0   :  { %10 = vsyncpa [#allocation3], 0  ;;  %s374_s0 = inlined_call_operand.hbm [shape: f32[8,128], index: 0, kind: input, shape index: {}]   ;;  %s375_s1 = inlined_call_operand.hbm [shape: f32[128,128], index: 1, kind: input, shape index: {}]   ;;  %s376_s2 = inlined_call_operand.hbm [shape: f32[8,128], index: 2, kind: input, shape index: {}]   ;;  %s377_s3 = inlined_call_operand.vmem [shape: f32[1,128], index: 3, kind: input, shape index: {}]   ;;  %s378_s4 = inlined_call_operand.vmem [shape: f32[1,128], index: 4, kind: input, shape index: {}]   ;;  %s379_s5 = inlined_call_operand.hbm [shape: f32[8,128], index: 5, kind: output, shape index: {}]  }
   0x1   :  { %11 = vsyncpa [#allocation6], 0  ;;  %s28_s20 = sshll.u32 %s375_s1, 4  ;;  %s29_s20 = int_to_ptr.hbm [resolvable:$true] %s28_s20 }
   0x2   :  { %12 = vsyncpa [#allocation4], 0  ;;  %s319_s21 = smov [#allocation5]   ;;  %s18_s25 = sshll.u32 %s374_s0, 4  ;;  %s19_s25 = int_to_ptr.hbm [resolvable:$true] %s18_s25 }
   0x3   :  { %s30_s22 = sshll.u32 %s319_s21, 4  ;;  %s320_s26 = smov 128   ;;  %s31_s22 = int_to_ptr.vmem [resolvable:$true] %s30_s22 }
   0x4   :  { %s321_s27 = smov 8   ;;  %s322_s28 = smov [#allocation2]  }
   0x5   :  { %36 = dma.hbm_to_vmem [thread:$0]  %s29_s20, 2048, %s31_s22, [#allocation6], %s320_s26, %s320_s26, %s321_s27  }
   0x6   :  { %s20_s29 = sshll.u32 %s322_s28, 4  ;;  %s42_s7 = sshll.u32 %s376_s2, 4  ;;  %s21_s29 = int_to_ptr.vmem [resolvable:$true] %s20_s29  ;;  %s43_s7 = int_to_ptr.hbm [resolvable:$true] %s42_s7 }
   0x7   :  { %23 = dma.hbm_to_vmem [thread:$0]  %s19_s25, 128, %s21_s29, [#allocation3]  }
   0x8   :  { %s323_s1 = smov [#allocation7]  }
   0x9   :  { %s44_s8 = sshll.u32 %s323_s1, 4  ;;  %s45_s8 = int_to_ptr.vmem [resolvable:$true] %s44_s8 }
   0xa   :  { %47 = dma.hbm_to_vmem [thread:$0]  %s43_s7, 128, %s45_s8, [#allocation6]  }
   0xb   :  { %313 = dma.done.wait [#allocation3], 128  }
   0xc   :  { %314 = vsyncadd [#allocation3], 4294967168 }
   0xd   :  { %315 = dma.done.wait [#allocation6], 2176  }
   0xe   :  { %316 = vsyncadd [#allocation6], 4294965120  ;;  %v86_v0 = vld [vmem:[#allocation5 + $0x78] sm:$0xff]  ;;  %v85_v1 = vld [vmem:[#allocation5 + $0x70] sm:$0xff]  ;;  %v324_v17 = vmov 8.0   ;;  %s189_s13 = sshll.u32 %s379_s5, 4  ;;  %s190_s13 = int_to_ptr.hbm [resolvable:$true] %s189_s13 }
   0xf   :  { %87 = vmatpush.msra.mxu0 %v86_v0  ;;  %v84_v2 = vld [vmem:[#allocation5 + $0x68] sm:$0xff]  ;;  %v83_v3 = vld [vmem:[#allocation5 + $0x60] sm:$0xff]  ;;  %v82_v4 = vld [vmem:[#allocation5 + $0x58] sm:$0xff]  ;;  %209 = vrcp.f32 %v324_v17 }
  0x10   :  { %v81_v5 = vld [vmem:[#allocation5 + $0x50] sm:$0xff]  ;;  %v80_v6 = vld [vmem:[#allocation5 + $0x48] sm:$0xff]  ;;  %v79_v7 = vld [vmem:[#allocation5 + $0x40] sm:$0xff] }
  0x11   :  { %88 = vmatpush.msra.mxu0 %v85_v1  ;;  %v78_v8 = vld [vmem:[#allocation5 + $0x38] sm:$0xff]  ;;  %v77_v9 = vld [vmem:[#allocation5 + $0x30] sm:$0xff]  ;;  %v76_v10 = vld [vmem:[#allocation5 + $0x28] sm:$0xff] }
  0x12   :  { %v75_v11 = vld [vmem:[#allocation5 + $0x20] sm:$0xff]  ;;  %v74_v12 = vld [vmem:[#allocation5 + $0x18] sm:$0xff]  ;;  %v73_v13 = vld [vmem:[#allocation5 + $0x10] sm:$0xff] }
  0x13   :  { %89 = vmatpush.msra.mxu0 %v84_v2  ;;  %v72_v14 = vld [vmem:[#allocation5 + $0x8] sm:$0xff]  ;;  %v71_v15 = vld [vmem:[#allocation5] sm:$0xff]  ;;  %v70_v16 = vld [vmem:[#allocation2] sm:$0xff] }
  0x14   :  { %v147_v48 = vld [vmem:[%s377_s3] sm:$0x1]  ;;  %s325_s3 = smov [#allocation8]  }
  0x15   :  { %90 = vmatpush.msra.mxu0 %v83_v3  ;;  %v210_v18 = vpop.eup %209  ;;  %v149_v51 = vld [vmem:[%s378_s4] sm:$0x1]  ;;  %s187_s4 = sshll.u32 %s325_s3, 4  ;;  %s188_s4 = int_to_ptr.vmem [resolvable:$true] %s187_s4 }
  0x16   :  { %v120_v19 = vmul.f32 8.0, %v210_v18  ;;  %vm124_vm0 = vweird.f32 %v210_v18 }
  0x17   :  { %91 = vmatpush.msra.mxu0 %v82_v4 }
  0x18   :  { %v121_v21 = vsub.f32 1.0, %v120_v19 }
  0x19   :  { %92 = vmatpush.msra.mxu0 %v81_v5  ;;  %v179_v5 = vld [vmem:[#allocation7] sm:$0xff] }
  0x1a   :  { %v122_v23 = vmul.f32 %v210_v18, %v121_v21 }
  0x1b   :  { %93 = vmatpush.msra.mxu0 %v80_v6 }
  0x1c   :  { %v123_v26 = vadd.f32 %v210_v18, %v122_v23 }
  0x1d   :  { %94 = vmatpush.msra.mxu0 %v79_v7 }
  0x1e   :  { %v125_v29 = vsel %vm124_vm0, %v210_v18, %v123_v26 }
  0x1f   :  { %95 = vmatpush.msra.mxu0 %v78_v8 }
  0x21   :  { %96 = vmatpush.msra.mxu0 %v77_v9 }
  0x23   :  { %97 = vmatpush.msra.mxu0 %v76_v10 }
  0x25   :  { %98 = vmatpush.msra.mxu0 %v75_v11 }
  0x27   :  { %99 = vmatpush.msra.mxu0 %v74_v12 }
  0x29   :  { %100 = vmatpush.msra.mxu0 %v73_v13 }
  0x2b   :  { %101 = vmatpush.msra.mxu0 %v72_v14 }
  0x2d   :  { %102 = vmatpush.msra.mxu0 %v71_v15 }
  0x2e   :  { %103 = vmatmul.f32.vlgmr.msra.gmra.mxu0 %v70_v16 }
  0xab   :  { %v104_v20 = vpop.f32.mrf.mxu0 }
  0xac   :  { %v113_v22 = vrot.slane %v104_v20, 4 }
  0xae   :  { %v114_v24 = vadd.f32 %v113_v22, %v104_v20 }
  0xb0   :  { %v115_v25 = vrot.slane %v114_v24, 2 }
  0xb2   :  { %v116_v27 = vadd.f32 %v115_v25, %v114_v24 }
  0xb4   :  { %v117_v28 = vrot.slane %v116_v27, 1 }
  0xb6   :  { %v118_v30 = vadd.f32 %v117_v28, %v116_v27 }
  0xb8   :  { %v126_v31 = vmul.f32 %v125_v29, %v118_v30 }
  0xba   :  { %v127_v32 = vsub.f32 %v104_v20, %v126_v31 }
  0xbc   :  { %v128_v33 = vmul.f32 %v127_v32, %v127_v32 }
  0xbe   :  { %v129_v34 = vrot.slane %v128_v33, 4 }
  0xc0   :  { %v130_v35 = vadd.f32 %v129_v34, %v128_v33 }
  0xc2   :  { %v131_v36 = vrot.slane %v130_v35, 2 }
  0xc4   :  { %v132_v37 = vadd.f32 %v131_v36, %v130_v35 }
  0xc6   :  { %v133_v38 = vrot.slane %v132_v37, 1 }
  0xc8   :  { %v134_v39 = vadd.f32 %v133_v38, %v132_v37 }
  0xca   :  { %v135_v40 = vmul.f32 %v134_v39, %v125_v29 }
  0xcc   :  { %v136_v41 = vadd.f32 1e-05, %v135_v40 }
  0xce   :  { %211 = vrsqrt.f32 %v136_v41  ;;  %vm143_vm2 = vweird.f32 %v136_v41 }
  0xd4   :  { %v212_v42 = vpop.eup %211 }
  0xd5   :  { %v138_v43 = vmul.f32 %v212_v42, %v136_v41  ;;  %vm144_vm1 = vweird.f32 %v212_v42 }
  0xd6   :  { %vm145_vm3 = vmor %vm143_vm2, %vm144_vm1 }
  0xd7   :  { %v139_v44 = vmul.f32 %v212_v42, %v138_v43 }
  0xd9   :  { %v140_v45 = vmul.f32 0.5, %v139_v44 }
  0xdb   :  { %v141_v46 = vsub.f32 1.5, %v140_v45 }
  0xdd   :  { %v142_v47 = vmul.f32 %v212_v42, %v141_v46 }
  0xdf   :  { %v146_v49 = vsel %vm145_vm3, %v212_v42, %v142_v47 }
  0xe0   :  { %v148_v50 = vmul.f32 %v147_v48, %v146_v49 }
  0xe2   :  { %v150_v52 = vmul.f32 %v148_v50, %v126_v31  ;;  %v153_v53 = vperm.slane %v148_v50, 0 }
  0xe4   :  { %v151_v54 = vsub.f32 %v149_v51, %v150_v52  ;;  %v155_v55 = vmul.f32 %v153_v53, %v104_v20 }
  0xe6   :  { %v157_v56 = vperm.slane %v151_v54, 0 }
  0xe8   :  { %v159_v57 = vadd.f32 %v157_v56, %v155_v55 }
  0xea   :  { %v200_v58 = vmul.f32 -1.442695, %v159_v57 }
  0xec   :  { %213 = vpow2.f32 %v200_v58 }
  0xf2   :  { %v214_v59 = vpop.eup %213 }
  0xf3   :  { %v163_v60 = vadd.f32 1.0, %v214_v59 }
  0xf5   :  { %215 = vrcp.f32 %v163_v60  ;;  %v175_v0 = vand.u32 2147483648, %v163_v60  ;;  %v173_v2 = vand.u32 2147483647, %v163_v60  ;;  %vm169_vm5 = vweird.f32 %v163_v60 }
  0xf7   :  { %v176_v4 = vor.u32 1.1754944e-38, %v175_v0  ;;  %vm174_vm7 = vcmp.eq.f32.partialorder %v173_v2, 8.507059e+37 }
  0xfb   :  { %v216_v61 = vpop.eup %215 }
  0xfc   :  { %v165_v62 = vmul.f32 %v216_v61, %v163_v60  ;;  %vm170_vm4 = vweird.f32 %v216_v61 }
  0xfd   :  { %vm171_vm6 = vmor %vm169_vm5, %vm170_vm4 }
  0xfe   :  { %v166_v63 = vsub.f32 1.0, %v165_v62 }
 0x100   :  { %v167_v1 = vmul.f32 %v216_v61, %v166_v63 }
 0x102   :  { %v168_v3 = vadd.f32 %v216_v61, %v167_v1 }
 0x104   :  { %v172_v6 = vsel %vm171_vm6, %v216_v61, %v168_v3 }
 0x105   :  { %v177_v7 = vsel %vm174_vm7, %v176_v4, %v172_v6 }
 0x106   :  { %v180_v8 = vmul.f32 %v179_v5, %v177_v7 }
 0x108   :  { %181 = vst [vmem:[#allocation8] sm:$0xff] %v180_v8 }
 0x109   :  { %192 = dma.vmem_to_hbm [thread:$0]  %s188_s4, 128, %s190_s13, [#allocation4]  }
 0x10a   :  { %317 = dma.done.wait [#allocation4], 128  }
 0x10b   :  { %318 = vsyncadd [#allocation4], 4294967168 }
 0x10c   :  { %197 = vsyncpa [#allocation3], 1 }
 0x10d   :  { %198 = vsyncpa [#allocation6], 1 }
 0x10e   :  { %199 = vsyncpa [#allocation4], 1 }

</bundles_post_ra>
